<compile_context>
chip_gen: v7x
topology: tpu7x:2x2x1
jax: 0.10.0
libtpu: 0.0.40
codegen_flags: <defaults>
</compile_context>

<pallas_src>
import functools

import jax
import jax.numpy as jnp
from jax.experimental import pallas as pl
from jax.experimental.pallas import tpu as pltpu

D_MODEL = 32
MAX_LEN = 200
SEQ = 8
BATCH = 2


def make_pe_table(max_len: int, d_model: int) -> jnp.ndarray:
    """Host-side PE buffer, matching the torch module's __init__ result."""
    pos = jnp.arange(max_len, dtype=jnp.float32)[:, None]                      # (max_len, 1)
    denom = jnp.power(
        10000.0, jnp.arange(0, d_model, 2, dtype=jnp.float32) / d_model)      # (d_model//2,)
    angles = pos / denom                                                       # (max_len, d/2)
    pe = jnp.zeros((max_len, d_model), jnp.float32)
    pe = pe.at[:, 0::2].set(jnp.sin(angles))
    pe = pe.at[:, 1::2].set(jnp.cos(angles))
    return pe


def _posenc_kernel(x_ref, pe_ref, out_ref):
    # x_ref: (B, L*D) lane-dense slab; pe_ref: (1, L*D) broadcast over batch
    # rows (a cheap sublane broadcast on the VPU).
    out_ref[...] = x_ref[...] + pe_ref[...]


@functools.partial(jax.jit, static_argnames=())
def positional_encoding(x: jnp.ndarray, pe_table: jnp.ndarray) -> jnp.ndarray:
    """x: (B, L, D); pe_table: (max_len, D).  Returns x + PE[:L] (eval path)."""
    B, L, D = x.shape
    pe = pe_table[:L].reshape(1, L * D).astype(x.dtype)     # (1, L*D)
    x2d = x.reshape(B, L * D)                               # lane-dense: L*D = 256 lanes

    out = pl.pallas_call(
        _posenc_kernel,
        out_shape=jax.ShapeDtypeStruct((B, L * D), x.dtype),
        in_specs=[
            pl.BlockSpec(memory_space=pltpu.MemorySpace.VMEM),   # x, whole array in VMEM
            pl.BlockSpec(memory_space=pltpu.MemorySpace.VMEM),   # PE slice, whole array
        ],
        out_specs=pl.BlockSpec(memory_space=pltpu.MemorySpace.VMEM),
    )(x2d, pe)
    # TODO(synk): nn.Dropout(p=0.1) treated as identity (inference / eval semantics).
    return out.reshape(B, L, D)


if __name__ == "__main__":
    key = jax.random.PRNGKey(0)
    x = jax.random.normal(key, (BATCH, SEQ, D_MODEL), jnp.float32)

    pe_table = make_pe_table(MAX_LEN, D_MODEL)
    y = positional_encoding(x, pe_table)
    jax.block_until_ready(y)

    # Pure-JAX reference for the eval (dropout = identity) path.
    ref = x + pe_table[None, :SEQ, :]
    assert y.shape == (BATCH, SEQ, D_MODEL)
    assert jnp.allclose(y, ref, atol=1e-6, rtol=1e-6), float(jnp.max(jnp.abs(y - ref)))
    print("KERNEL_OK")
</pallas_src>

<mosaic_0001>
module attributes {stable_mosaic.version = 11 : i64} {
  func.func @_posenc_kernel(%arg0: memref<2x256xf32, #tpu.memory_space<vmem>>, %arg1: memref<1x256xf32, #tpu.memory_space<vmem>>, %arg2: memref<2x256xf32, #tpu.memory_space<vmem>>) attributes {dimension_semantics = [], scalar_prefetch = 0 : i64, scratch_operands = 0 : i64, tpu.core_type = #tpu.core_type<tc>} {
    %c0 = arith.constant 0 : index
    %c0_0 = arith.constant 0 : index
    %0 = vector.load %arg0[%c0, %c0_0] : memref<2x256xf32, #tpu.memory_space<vmem>>, vector<2x256xf32>
    %c0_1 = arith.constant 0 : index
    %c0_2 = arith.constant 0 : index
    %1 = vector.load %arg1[%c0_1, %c0_2] : memref<1x256xf32, #tpu.memory_space<vmem>>, vector<1x256xf32>
    %2 = vector.broadcast %1 : vector<1x256xf32> to vector<2x256xf32>
    %3 = arith.addf %0, %2 : vector<2x256xf32>
    %c0_3 = arith.constant 0 : index
    %c0_4 = arith.constant 0 : index
    %4 = vector.load %arg2[%c0_3, %c0_4] : memref<2x256xf32, #tpu.memory_space<vmem>>, vector<2x256xf32>
    tpu.vector_store %arg2[%c0_3, %c0_4], %3 {strides = array<i32>} : memref<2x256xf32, #tpu.memory_space<vmem>>, vector<2x256xf32>,
    return
  }
}

</mosaic_0001>

<bundles_post_ra>
// kernel: positional_encoding.1
= control target key start
LH: loop header
LB: loop body
LE: loop exit
PB: predicated region body
PF: predicated region fallthrough
CT: control target
= control target key end

     0   :  { %v14_v0 = vlaneseq  ;;  %v38_v1 = vmov 1983009808   ;;  %s63_s1 = inlined_call_operand.vmem [shape: f32[1,256], index: 1, kind: input, shape index: {}]   ;;  %s64_s0 = inlined_call_operand.vmem [shape: f32[2,256], index: 0, kind: input, shape index: {}]   ;;  %s65_s2 = inlined_call_operand.vmem [shape: f32[2,256], index: 2, kind: output, shape index: {}]  }
   0x1   :  { %v24_v2 = vunpack.c.l.s4 %v38_v1  ;;  %v12_v4 = vld [vmem:[%s63_s1] sm:$0x3] }
   0x2   :  { %v15_v3 = vshrl.u32 %v14_v0, 7  ;;  %v11_v12 = vld [vmem:[%s64_s0] sm:$0xf] }
   0x3   :  { %v25_v5 = vunpack.c.0.s8 %v24_v2 }
   0x4   :  { %v16_v6 = vsub.s32 0, %v15_v3  ;;  %v20_v7 = vsub.s32 1, %v15_v3 }
   0x5   :  { %v28_v10 = vsub.s32 %v25_v5, %v15_v3 }
   0x6   :  { %v17_v8 = vrot.slane %v12_v4, %v16_v6  ;;  %v21_v9 = vrot.slane %v12_v4, %v20_v7 }
   0x8   :  { %v22_v11 = vcombine.low %v17_v8, %v21_v9 }
   0xa   :  { %v29_v13 = vrot.slane %v22_v11, %v28_v10 }
   0xc   :  { %v31_v14 = vadd.f32 %v29_v13, %v11_v12 }
   0xe   :  { %32 = vst [vmem:[%s65_s2] sm:$0xf] %v31_v14 }

</bundles_post_ra>
